<compile_context>
chip_gen: v5e
topology: v5e:2x2
jax: 0.10.0
libtpu: 0.0.40
codegen_flags: <defaults>
</compile_context>

<pallas_src>
import functools

import jax
import jax.numpy as jnp
from jax import lax
from jax.experimental import pallas as pl
from jax.experimental.pallas import tpu as pltpu

BANDS_NUM_MATERIAL = 6


def _vmem_plan():
    """Return (per-input-block byte budget, vmem_limit_bytes), generation-aware."""
    try:
        cap = int(pltpu.get_tpu_info().vmem_capacity_bytes)
    except Exception:
        cap = 64 * 1024 * 1024  # conservative (v7x-class per-TC VMEM)
    if cap >= 128 * 1024 * 1024:                     # v5e / v6e: 128 MiB physical
        return 16 * 1024 * 1024, 64 * 1024 * 1024
    return 8 * 1024 * 1024, 40 * 1024 * 1024          # v7x-class: 64 MiB per TC


def _largest_divisor(dim, unit, cap):
    """Largest multiple of `unit` dividing `dim` with value <= cap, else None."""
    best = None
    t = unit
    limit = min(dim, cap)
    while t <= limit:
        if dim % t == 0:
            best = t
        t += unit
    return best


def _pick_tiles(rows, hw, itemsize, block_budget):
    """Pick (tile_r, tile_hw). Lane tile grows first toward the byte budget."""
    hw_pad = ((hw + 127) // 128) * 128
    lane_budget = max(128, ((block_budget // (8 * itemsize)) // 128) * 128)
    tile_hw = min(hw_pad, lane_budget, 32768)

    if rows % 8 != 0:
        # Odd row count: one full-rows block; shrink lanes to respect the budget.
        tile_hw = min(
            tile_hw,
            max(128, ((block_budget // (max(rows, 8) * itemsize)) // 128) * 128))
        return rows, tile_hw

    max_r = max(8, min((block_budget // (tile_hw * itemsize)) // 8 * 8, 1024))
    if rows >= 16:
        max_r = min(max_r, rows // 2)   # >=2 row blocks -> both TCs on v7x
    tile_r = None
    if max_r >= 128:
        tile_r = _largest_divisor(rows, 128, max_r)   # multiple-of-128 row tile
    if tile_r is None:
        tile_r = _largest_divisor(rows, 8, min(max_r, 128)) or 8
    return tile_r, tile_hw


def _pool_mean_kernel(x_ref, out_ref, acc_ref, *, hw, tile_hw, needs_mask):
    # x_ref  : (tile_r, tile_hw)  input tile (rows = flattened B*C_i).
    # out_ref: (tile_r, 1)        per-row spatial mean (written at last k only).
    # acc_ref: (tile_r, 128) f32  running partial sums, persistent across k.
    k = pl.program_id(1)
    tile_r = acc_ref.shape[0]
    n_chunks = tile_hw // 128
    unroll = min(8, n_chunks)

    @pl.when(k == 0)
    def _init():
        acc_ref[...] = jnp.zeros_like(acc_ref)

    lane = lax.broadcasted_iota(jnp.int32, (1, 128), 1) if needs_mask else None

    # Static Python loop over <=8 row groups of <=128 rows keeps the register
    # working set to one (sub_r,128) chunk + one (sub_r,128) accumulator.
    for r0 in range(0, tile_r, 128):
        r1 = min(r0 + 128, tile_r)

        def chunk_body(i, acc, r0=r0, r1=r1):
            c0 = pl.multiple_of(i * 128, 128)
            chunk = x_ref[r0:r1, pl.ds(c0, 128)].astype(jnp.float32)
            if needs_mask:
                col = k * tile_hw + i * 128 + lane        # (1, 128) global col idx
                chunk = jnp.where(col < hw, chunk, 0.0)   # mask padded boundary
            return acc + chunk

        acc_ref[r0:r1, :] = lax.fori_loop(
            0, n_chunks, chunk_body, acc_ref[r0:r1, :], unroll=unroll)

    @pl.when(k == pl.num_programs(1) - 1)
    def _finalize():
        out_ref[...] = (jnp.sum(acc_ref[...], axis=-1, keepdims=True)
                        * (1.0 / hw)).astype(out_ref.dtype)


def _global_avg_pool(x, block_budget, vmem_limit):
    """(B, C, H, W) -> (B, C) spatial mean via a tiled, pipelined Pallas kernel."""
    b, c, h, w = x.shape
    hw = h * w
    rows = b * c
    x2 = x.reshape(rows, hw)  # contiguous collapse: no HBM copy

    itemsize = jnp.dtype(x.dtype).itemsize
    tile_r, tile_hw = _pick_tiles(rows, hw, itemsize, block_budget)
    grid = (pl.cdiv(rows, tile_r), pl.cdiv(hw, tile_hw))
    needs_mask = (hw % tile_hw) != 0

    out = pl.pallas_call(
        functools.partial(_pool_mean_kernel, hw=hw, tile_hw=tile_hw,
                          needs_mask=needs_mask),
        out_shape=jax.ShapeDtypeStruct((rows, 1), jnp.float32),
        grid=grid,
        in_specs=[pl.BlockSpec((tile_r, tile_hw), lambda r, k: (r, k))],
        out_specs=pl.BlockSpec((tile_r, 1), lambda r, k: (r, 0)),
        scratch_shapes=[pltpu.VMEM((tile_r, 128), jnp.float32)],
        compiler_params=pltpu.CompilerParams(
            dimension_semantics=("parallel", "arbitrary"),
            vmem_limit_bytes=vmem_limit,
        ),
        cost_estimate=pl.CostEstimate(
            flops=rows * hw,
            transcendentals=0,
            bytes_accessed=rows * hw * itemsize + rows * 4,
        ),
    )(x2)
    return out.reshape(b, c)


def _se_mlp_kernel(y_ref, w1_ref, w2_ref, out_ref):
    # y_ref : (B, C) pooled; w1_ref: (C, H1); w2_ref: (H1, 6); out_ref: (B, 6).
    y = y_ref[...]
    h = jnp.dot(y, w1_ref[...], preferred_element_type=jnp.float32)
    h = jnp.maximum(h, 0.0)
    logits = jnp.dot(h, w2_ref[...], preferred_element_type=jnp.float32)
    m = jnp.max(logits, axis=-1, keepdims=True)
    e = jnp.exp(logits - m)
    s = jnp.sum(e, axis=-1, keepdims=True)
    out_ref[...] = (e / s).astype(out_ref.dtype)


def _se_mlp(y, w1_t, w2_t):
    b, c = y.shape
    hid = w1_t.shape[1]
    return pl.pallas_call(
        _se_mlp_kernel,
        out_shape=jax.ShapeDtypeStruct((b, BANDS_NUM_MATERIAL), jnp.float32),
        grid=(1,),
        in_specs=[
            pl.BlockSpec((b, c), lambda i: (0, 0)),
            pl.BlockSpec((c, hid), lambda i: (0, 0)),
            pl.BlockSpec((hid, BANDS_NUM_MATERIAL), lambda i: (0, 0)),
        ],
        out_specs=pl.BlockSpec((b, BANDS_NUM_MATERIAL), lambda i: (0, 0)),
    )(y, w1_t, w2_t)


def se_layer_material(x_list, w1, w2):
    """Pallas forward of SELayerMaterial.

    x_list: list of NCHW arrays (same B/H/W; channels concatenated logically).
    w1: fc1 weight, torch layout (C//r, C). w2: fc2 weight, torch layout (6, C//r).
    Returns (B, 6) float32 softmax weights.
    """
    block_budget, vmem_limit = _vmem_plan()
    # Pool each input separately -> only tiny (B, C_i) results get concatenated,
    # avoiding a full extra HBM round trip for the big feature maps.
    pooled = [_global_avg_pool(x, block_budget, vmem_limit) for x in x_list]
    y = jnp.concatenate(pooled, axis=1).astype(jnp.float32)  # (B, C), tiny
    w1_t = jnp.asarray(w1, jnp.float32).T                    # (C, C//r)
    w2_t = jnp.asarray(w2, jnp.float32).T                    # (C//r, 6)
    return _se_mlp(y, w1_t, w2_t)


def _reference(x_list, w1, w2):
    x = jnp.concatenate(x_list, axis=1).astype(jnp.float32)
    y = jnp.mean(x, axis=(2, 3))
    h = jnp.maximum(y @ w1.T, 0.0)
    logits = h @ w2.T
    return jax.nn.softmax(logits, axis=-1)


if __name__ == "__main__":
    key = jax.random.PRNGKey(0)
    k1, k2, k3, k4 = jax.random.split(key, 4)

    # Two feature maps (B=2, C_i=16, H=16, W=16) -> logical concat C=32.
    B, C1, C2, H, W = 2, 16, 16, 16, 16
    C = C1 + C2
    reduction = 16
    hidden = C // reduction  # 2

    x0 = jax.random.normal(k1, (B, C1, H, W), dtype=jnp.float32)
    x1 = jax.random.normal(k2, (B, C2, H, W), dtype=jnp.float32)

    # Deterministic synthetic weights in torch Linear layout (out, in).
    w1 = jax.random.normal(k3, (hidden, C), dtype=jnp.float32) * 0.1
    w2 = jax.random.normal(k4, (BANDS_NUM_MATERIAL, hidden), dtype=jnp.float32) * 0.1

    out = jax.block_until_ready(se_layer_material([x0, x1], w1, w2))
    ref = _reference([x0, x1], w1, w2)

    assert out.shape == (B, BANDS_NUM_MATERIAL)
    assert jnp.allclose(out, ref, atol=1e-5, rtol=1e-5), (out, ref)

    print("KERNEL_OK")
</pallas_src>

<mosaic_0001>
module attributes {stable_mosaic.version = 11 : i64} {
  func.func @_pool_mean_kernel(%arg0: i32, %arg1: i32, %arg2: memref<16x256xf32, #tpu.memory_space<vmem>>, %arg3: memref<16x1xf32, #tpu.memory_space<vmem>>, %arg4: memref<16x128xf32, #tpu.memory_space<vmem>>) attributes {dimension_semantics = [#tpu.dimension_semantics<parallel>, #tpu.dimension_semantics<arbitrary>], iteration_bounds = array<i64: 2, 1>, scalar_prefetch = 0 : i64, scratch_operands = 1 : i64, tpu.core_type = #tpu.core_type<tc>, window_params = [{transform_indices = @transform_0, window_bounds = array<i64: 16, 256>}, {transform_indices = @transform_1, window_bounds = array<i64: 16, 1>}]} {
    %c0_i32 = arith.constant 0 : i32
    %0 = arith.cmpi eq, %arg1, %c0_i32 : i32
    %1 = arith.extui %0 : i1 to i32
    %c0_i32_0 = arith.constant 0 : i32
    %2 = arith.cmpi ne, %1, %c0_i32_0 : i32
    scf.if %2 {
      %cst = arith.constant 0.000000e+00 : f32
      %18 = vector.broadcast %cst : f32 to vector<16x128xf32>
      %c0_10 = arith.constant 0 : index
      %c0_11 = arith.constant 0 : index
      %19 = vector.load %arg4[%c0_10, %c0_11] : memref<16x128xf32, #tpu.memory_space<vmem>>, vector<16x128xf32>
      tpu.vector_store %arg4[%c0_10, %c0_11], %18 {strides = array<i32>} : memref<16x128xf32, #tpu.memory_space<vmem>>, vector<16x128xf32>,
    } else {
    }
    %c0 = arith.constant 0 : index
    %c0_1 = arith.constant 0 : index
    %3 = vector.load %arg4[%c0, %c0_1] : memref<16x128xf32, #tpu.memory_space<vmem>>, vector<16x128xf32>
    %c0_i32_2 = arith.constant 0 : i32
    %c128_i32 = arith.constant 128 : i32
    %4 = arith.muli %c0_i32_2, %c128_i32 : i32
    %5 = tpu.assume_multiple %4, 128 : i32
    %c0_3 = arith.constant 0 : index
    %6 = arith.index_cast %5 : i32 to index
    %7 = vector.load %arg2[%c0_3, %6] : memref<16x256xf32, #tpu.memory_space<vmem>>, vector<16x128xf32>
    %8 = arith.addf %3, %7 : vector<16x128xf32>
    %c1_i32 = arith.constant 1 : i32
    %c128_i32_4 = arith.constant 128 : i32
    %9 = arith.muli %c1_i32, %c128_i32_4 : i32
    %10 = tpu.assume_multiple %9, 128 : i32
    %c0_5 = arith.constant 0 : index
    %11 = arith.index_cast %10 : i32 to index
    %12 = vector.load %arg2[%c0_5, %11] : memref<16x256xf32, #tpu.memory_space<vmem>>, vector<16x128xf32>
    %13 = arith.addf %8, %12 : vector<16x128xf32>
    %c2_i32 = arith.constant 2 : i32
    %c0_6 = arith.constant 0 : index
    %c0_7 = arith.constant 0 : index
    %14 = vector.load %arg4[%c0_6, %c0_7] : memref<16x128xf32, #tpu.memory_space<vmem>>, vector<16x128xf32>
    tpu.vector_store %arg4[%c0_6, %c0_7], %13 {strides = array<i32>} : memref<16x128xf32, #tpu.memory_space<vmem>>, vector<16x128xf32>,
    %c0_i32_8 = arith.constant 0 : i32
    %15 = arith.cmpi eq, %arg1, %c0_i32_8 : i32
    %16 = arith.extui %15 : i1 to i32
    %c0_i32_9 = arith.constant 0 : i32
    %17 = arith.cmpi ne, %16, %c0_i32_9 : i32
    scf.if %17 {
      %c0_10 = arith.constant 0 : index
      %c0_11 = arith.constant 0 : index
      %18 = vector.load %arg4[%c0_10, %c0_11] : memref<16x128xf32, #tpu.memory_space<vmem>>, vector<16x128xf32>
      %cst = arith.constant dense<0.000000e+00> : vector<16xf32>
      %19 = vector.multi_reduction <add>, %18, %cst [1] : vector<16x128xf32> to vector<16xf32>
      %20 = vector.shape_cast %19 : vector<16xf32> to vector<16x1xf32>
      %cst_12 = arith.constant 3.906250e-03 : f32
      %21 = vector.broadcast %cst_12 : f32 to vector<16x1xf32>
      %22 = arith.mulf %20, %21 : vector<16x1xf32>
      %c0_13 = arith.constant 0 : index
      %c0_14 = arith.constant 0 : index
      %23 = vector.load %arg3[%c0_13, %c0_14] : memref<16x1xf32, #tpu.memory_space<vmem>>, vector<16x1xf32>
      tpu.vector_store %arg3[%c0_13, %c0_14], %22 {strides = array<i32>} : memref<16x1xf32, #tpu.memory_space<vmem>>, vector<16x1xf32>,
    } else {
    }
    return
  }
  func.func @transform_0(%arg0: i32, %arg1: i32) -> (i32, i32) {
    %c0_i32 = arith.constant 0 : i32
    return %arg0, %arg1 : i32, i32
  }
  func.func @transform_1(%arg0: i32, %arg1: i32) -> (i32, i32) {
    %c0_i32 = arith.constant 0 : i32
    %c0_i32_0 = arith.constant 0 : i32
    return %arg0, %c0_i32 : i32, i32
  }
}

</mosaic_0001>

<bundles_post_ra>
// kernel: tpu_custom_call.1
= control target key start
LH: loop header
LB: loop body
LE: loop exit
PB: predicated region body
PF: predicated region fallthrough
CT: control target
= control target key end

     0   :  { %6 = vsyncpa [#allocation4], 0  ;;  %s527_s0 = inlined_call_operand.hbm [shape: f32[32,256], index: 0, kind: input, shape index: {}]   ;;  %s528_s1 = inlined_call_operand.vmem [shape: f32[32,1], index: 1, kind: output, shape index: {}]  }
   0x1   :  { %8 = vsyncpa [#allocation4 + $0x1], 0  ;;  %s440_s6 = smov 0   ;;  %s442_s7 = smov 0  }
   0x2   :  { %s444_s8 = smov 0   ;;  %s446_s9 = smov 0  }
   0x3   :  { %s448_s10 = smov 0   ;;  %s450_s11 = smov 0  }
   0x4 LB: > { %s271_s12 = sadd.s32 4294967295, %s426_s11   ;;  %s26_s13 = sadd.s32 1, %s422_s10  ;;  %s426_s11 = sphi %s450_s11, %s14_s11   ;;  %s422_s10 = sphi %s448_s10, %s535_s10   ;;  %s418_s9 = sphi %s446_s9, %s534_s9   ;;  %s414_s8 = sphi %s444_s8, %s533_s8   ;;  %s410_s7 = sphi %s442_s7, %s532_s7   ;;  %s406_s6 = sphi %s440_s6, %s531_s6  }
   0x5   : > { %p28_p0 = scmp.ge.s32.totalorder %s26_s13, 2  ;;  %s35_s14 = sadd.s32 1, %s414_s8 }
   0x6   : > { %p42_p1 = scmp.ne.s32.totalorder %s414_s8, %s410_s7  ;;  %p43_p2 = scmp.eq.s32.totalorder %s426_s11, 0 }
   0x7   : > { %s537_s13 = smov (%p28_p0, %s26_s13), 0  ;;  %p48_p4 = scmp.ne.s32.totalorder %s410_s7, %s406_s6 }
   0x8   : > { %p476_p3 = por %p43_p2, %p42_p1  ;;  %s30_s16 = ssub.s32 %s422_s10, %s537_s13 }
   0x9   : > { %p49_p5 = scmp.eq.s32.totalorder %s271_s12, 0  ;;  %p33_p6 = scmp.eq.s32.totalorder %s30_s16, 0 }
   0xa   : > { %p295_p8 = scmp.lt.s32.totalorder %s426_s11, 2  ;;  %s98_s19 = sand.u32 1, %s414_s8  }
   0xb   : > { %p483_p7 = por %p49_p5, %p48_p4  ;;  %s288_s20 = sshll.u32 %s422_s10, 5 }
   0xc   : > { %s489_s18 = scalar_select %p33_p6, %s414_s8, %s35_s14  }
   0xd   : > { %s275_s21 = sshll.u32 %s98_s19, 5  ;;  %s110_s24 = scalar_lea.hbm %s527_s0, %s288_s20 }
   0xe   : > { %s111_s25 = sshll.u32 %s110_s24, 4  ;;  %s102_s26 = scalar_lea.vmem [#allocation3], %s275_s21  ;;  %s112_s25 = int_to_ptr.hbm [resolvable:$true] %s111_s25 }
   0xf   : > { %s113_s27 = sshll.u32 %s102_s26, 4  ;;  %p292_p9 = pnand %p295_p8, %p476_p3  ;;  %s114_s27 = int_to_ptr.vmem [resolvable:$true] %s113_s27 }
  0x10   : > { %p279_p10 = scmp.ge.s32.totalorder %s426_s11, 1  ;;  %p121_p11 = scmp.lt.s32.totalorder %s426_s11, 3 }
  0x11   : > { %s99_s28 = scalar_lea.sflag [#allocation4], %s98_s19  ;;  %s428_s29 = smov 256  }
  0x12   : > { %s429_s30 = smov 16   ;;  %p122_p12 = pnand %p279_p10, %p121_p11 }
  0x13   : > { %294 = dma.hbm_to_vmem [thread:$0]  (!%p292_p9), %s112_s25, 512, %s114_s27, %s99_s28, %s428_s29, %s428_s29, %s429_s30  }
  0x14   : > { %125 = sbr.rel (%p122_p12) target bundleno = 156 (0x9c), region = 24  ;;  %s127_s2 = sand.u32 (!%p122_p12), 1, %s410_s7  }
  0x15   : > { %s280_s3 = sshll.u32 (!%p122_p12), %s127_s2, 5  ;;  %s128_s4 = scalar_lea.sflag (!%p122_p12), [#allocation4], %s127_s2 }
  0x16   : > { %s131_s5 = scalar_lea.vmem (!%p122_p12), [#allocation3], %s280_s3 }
  0x19   : > { %401 = dma.done.wait (%p483_p7), %s128_s4, 512  }
  0x1a   : > { %403 = vsyncadd (%p483_p7), %s128_s4, 4294966784  ;;  %v167_v0 = vld [vmem:[%s131_s5] sm:$0xff]  ;;  %v283_v1 = vld [vmem:[%s131_s5 + $0x8] sm:$0xff]  ;;  %s281_s6 = sshll.u32 %s418_s9, 1  ;;  %vm189_vm0 = vcmask 7168  }
  0x1b   : > { %v174_v2 = vadd.f32 %v283_v1, %v167_v0  ;;  %v168_v3 = vld [vmem:[%s131_s5 + $0x10] sm:$0xff]  ;;  %v284_v4 = vld [vmem:[%s131_s5 + $0x18] sm:$0xff]  ;;  %p154_p13 = scmp.lt.s32.totalorder %s281_s6, 3 }
  0x1c   : > { %v175_v5 = vadd.f32 %v284_v4, %v168_v3 }
  0x1d   : > { %183 = vadd.xlane.f32.xlu0 %v174_v2  ;;  %s539_s6 = smov (!%p154_p13, %s281_s6), 3 }
  0x1e   : > { %s282_s12 = sshll.u32 %s539_s6, 3 }
  0x1f   : > { %s157_s16 = scalar_lea.vmem %s528_s1, %s282_s12 }
  0x25   : > { %185 = vadd.xlane.f32.xlu0 %v175_v5 }
  0x90   : > { %v184_v6 = vpop.xlane.xlu0 %183 }
  0x91   : > { %v187_v7 = vmul.f32 0.00390625, %v184_v6 }
  0x93   : > { %190 = vst.msk [vmem:[%s157_s16] sm:$0xff] %vm189_vm0, %v187_v7 }
  0x98   : > { %v186_v8 = vpop.xlane.xlu0 %185 }
  0x99   : > { %v188_v9 = vmul.f32 0.00390625, %v186_v8 }
  0x9b   : > { %191 = vst.msk [vmem:[%s157_s16 + $0x8] sm:$0xff] %vm189_vm0, %v188_v9 }
  0x9c PF: > { %s14_s11 = sadd.s32 1, %s426_s11   ;;  %s531_s6 = smov %s410_s7 }
  0x9d   : > { %p11_p0 = scmp.ge.s32.totalorder %s14_s11, 4   ;;  %s532_s7 = smov %s414_s8 }
  0x9e   : > { %s533_s8 = smov %s489_s18  ;;  %s534_s9 = smov %s422_s10 }
  0x9f   : > { %s535_s10 = smov %s537_s13  ;;  %13 = sbr.rel (!%p11_p0) target bundleno = 4 (0x4), region = 73 }
  0xa4   :  { %214 = vsyncpa [#allocation4], 1 }
  0xa5   :  { %216 = vsyncpa [#allocation4 + $0x1], 1 }

</bundles_post_ra>
